<compile_context>
chip_gen: v6e
topology: v6e:2x2x1
jax: 0.10.0
libtpu: 0.0.40
codegen_flags: <defaults>
</compile_context>

<pallas_src>
import functools

import jax
import jax.numpy as jnp
from jax.experimental import pallas as pl
from jax.experimental.pallas import tpu as pltpu


def _round_up(x, m):
    return ((x + m - 1) // m) * m


def mlp_kernel(x_ref, w11_ref, b11_ref, w2a_ref, w2b_ref, b2_ref,
               w3_ref, b3_ref, o_ref):
    _, tm, d1 = x_ref.shape
    cd = w11_ref.dtype                       # matmul input dtype (f32 or bf16)

    # fc11 on both halves of the pair in a single (2*tm, d1) @ (d1, H) matmul.
    xx = x_ref[...].reshape(2 * tm, d1)      # merge leading dims (tm % 8 == 0)
    h = jnp.maximum(
        jnp.dot(xx, w11_ref[...], preferred_element_type=jnp.float32)
        + b11_ref[...], 0.0)
    h11 = h[:tm].astype(cd)                  # aligned sublane slices
    h12 = h[tm:].astype(cd)

    # fc2 on cat((h11, h12), feature-dim) expressed as split matmuls, then ReLU.
    h2 = jnp.maximum(
        jnp.dot(h11, w2a_ref[...], preferred_element_type=jnp.float32)
        + jnp.dot(h12, w2b_ref[...], preferred_element_type=jnp.float32)
        + b2_ref[...], 0.0).astype(cd)

    # fc3 (output width padded to a lane-dense multiple of 128) then softmax.
    logits = (jnp.dot(h2, w3_ref[...], preferred_element_type=jnp.float32)
              + b3_ref[...])
    m = jnp.max(logits, axis=-1, keepdims=True)
    e = jnp.exp(logits - m)
    o_ref[...] = e * pl.reciprocal(jnp.sum(e, axis=-1, keepdims=True),
                                   approx=True)


@functools.partial(jax.jit, static_argnames=("tm", "compute_dtype"))
def mlp_forward(x, params, *, tm=512, compute_dtype=jnp.float32):
    """x: (2, B, S, d1) float32. Returns softmax(fc3(...)) of shape (B, S, d2)."""
    w11, b11, w2, b2, w3, b3 = params
    d1, H = w11.shape
    d2 = w3.shape[1]
    two, B, S, _ = x.shape
    assert two == 2
    M = B * S

    # --- Row tiling: biggest tile up to `tm`, rows padded to a multiple of 8.
    # Force >=2 grid steps (v7x megacore) only when each half still gets a
    # sizeable tile; tiny problems run in a single step (per-step overhead
    # ~0.35 us would otherwise dominate on 1-TC chips).
    m_pad8 = _round_up(M, 8)
    grid_n = max(1, pl.cdiv(m_pad8, tm))
    if grid_n == 1 and m_pad8 >= 512:
        grid_n = 2
    tm_eff = _round_up(pl.cdiv(m_pad8, grid_n), 8)
    grid_n = pl.cdiv(m_pad8, tm_eff)
    m_pad = grid_n * tm_eff

    # --- Lane-dense output: pad fc3 output columns up to a multiple of 128,
    # --- pad bias = -1e30 so the softmax sends the pad columns to exactly 0.
    d2_pad = _round_up(d2, 128)

    xs = x.reshape(2, M, d1)
    if m_pad != M:
        xs = jnp.pad(xs, ((0, 0), (0, m_pad - M), (0, 0)))
    xs = xs.astype(compute_dtype)

    w3p, b3p = w3, b3
    if d2_pad != d2:
        w3p = jnp.pad(w3, ((0, 0), (0, d2_pad - d2)))
        b3p = jnp.pad(b3, ((0, d2_pad - d2),), constant_values=-1e30)

    # Weights in compute dtype (bf16 recommended on v6e/v7x); biases stay f32
    # since matmul accumulation is f32.
    w11c = w11.astype(compute_dtype)
    # Split fc2 weight along its input dim: cat(x11,x12)@W2 == x11@W2[:H] + x12@W2[H:]
    w2ac = w2[:H, :].astype(compute_dtype)
    w2bc = w2[H:, :].astype(compute_dtype)
    w3c = w3p.astype(compute_dtype)
    b11_2d = b11.reshape(1, H).astype(jnp.float32)
    b2_2d = b2.reshape(1, H).astype(jnp.float32)
    b3_2d = b3p.reshape(1, d2_pad).astype(jnp.float32)

    rows = lambda i: (0, i, 0)     # activation tiles walk the row axis
    full = lambda i: (0, 0)        # weights/biases: constant block (VMEM-resident)

    out = pl.pallas_call(
        mlp_kernel,
        out_shape=jax.ShapeDtypeStruct((m_pad, d2_pad), jnp.float32),
        grid_spec=pltpu.PrefetchScalarGridSpec(
            num_scalar_prefetch=0,
            grid=(grid_n,),
            in_specs=[
                pl.BlockSpec((2, tm_eff, d1), rows),   # stacked pair input
                pl.BlockSpec((d1, H), full),           # w11
                pl.BlockSpec((1, H), full),            # b11
                pl.BlockSpec((H, H), full),            # w2[:H]
                pl.BlockSpec((H, H), full),            # w2[H:]
                pl.BlockSpec((1, H), full),            # b2
                pl.BlockSpec((H, d2_pad), full),       # w3 (lane-padded)
                pl.BlockSpec((1, d2_pad), full),       # b3 (lane-padded)
            ],
            out_specs=pl.BlockSpec((tm_eff, d2_pad), lambda i: (i, 0)),
        ),
        compiler_params=pltpu.CompilerParams(
            dimension_semantics=("parallel",),
            vmem_limit_bytes=32 * 1024 * 1024),
    )(xs, w11c, b11_2d, w2ac, w2bc, b2_2d, w3c, b3_2d)

    return out[:M, :d2].reshape(B, S, d2)


def init_params(key, d1, d2, hiddensize):
    """Deterministic Linear-style init; weights stored as (in, out)."""
    ks = jax.random.split(key, 6)

    def lin(kw, kb, fan_in, fan_out):
        bound = 1.0 / jnp.sqrt(fan_in)
        w = jax.random.uniform(kw, (fan_in, fan_out), jnp.float32, -bound, bound)
        b = jax.random.uniform(kb, (fan_out,), jnp.float32, -bound, bound)
        return w, b

    w11, b11 = lin(ks[0], ks[1], d1, hiddensize)
    w2, b2 = lin(ks[2], ks[3], 2 * hiddensize, hiddensize)
    w3, b3 = lin(ks[4], ks[5], hiddensize, d2)
    return (w11, b11, w2, b2, w3, b3)


def mlp_reference(x, params):
    """Pure-JAX reference matching the PyTorch forward."""
    w11, b11, w2, b2, w3, b3 = params
    x11 = jax.nn.relu(x[0] @ w11 + b11)
    x12 = jax.nn.relu(x[1] @ w11 + b11)
    x2 = jax.nn.relu(jnp.concatenate((x11, x12), axis=2) @ w2 + b2)
    return jax.nn.softmax(x2 @ w3 + b3, axis=2)


if __name__ == "__main__":
    key = jax.random.PRNGKey(0)
    d1, d2, hiddensize = 32, 16, 32
    B, S = 2, 8

    k_x, k_p = jax.random.split(key)
    # x stacks the two inputs of the pair: x[0], x[1] each (B, S, d1).
    x = jax.random.normal(k_x, (2, B, S, d1), jnp.float32)
    params = init_params(k_p, d1, d2, hiddensize)

    ref = mlp_reference(x, params)

    # f32 MXU path (tolerance loosened slightly for the approx-EUP reciprocal).
    out = mlp_forward(x, params)
    jax.block_until_ready(out)
    assert out.shape == (B, S, d2)
    assert jnp.allclose(out, ref, atol=2e-3, rtol=2e-3)

    # bf16 matmul-input path (recommended on v6e/v7x), f32 accumulation.
    out_bf16 = mlp_forward(x, params, compute_dtype=jnp.bfloat16)
    jax.block_until_ready(out_bf16)
    assert jnp.allclose(out_bf16, ref, atol=5e-2, rtol=5e-2)

    print("KERNEL_OK")
</pallas_src>

<mosaic_0001>
module attributes {stable_mosaic.version = 11 : i64} {
  func.func @mlp_kernel(%arg0: i32, %arg1: memref<2x16x32xf32, #tpu.memory_space<vmem>>, %arg2: memref<32x32xf32, #tpu.memory_space<vmem>>, %arg3: memref<1x32xf32, #tpu.memory_space<vmem>>, %arg4: memref<32x32xf32, #tpu.memory_space<vmem>>, %arg5: memref<32x32xf32, #tpu.memory_space<vmem>>, %arg6: memref<1x32xf32, #tpu.memory_space<vmem>>, %arg7: memref<32x128xf32, #tpu.memory_space<vmem>>, %arg8: memref<1x128xf32, #tpu.memory_space<vmem>>, %arg9: memref<16x128xf32, #tpu.memory_space<vmem>>) attributes {dimension_semantics = [#tpu.dimension_semantics<parallel>], iteration_bounds = array<i64: 1>, scalar_prefetch = 0 : i64, scratch_operands = 0 : i64, tpu.core_type = #tpu.core_type<tc>, window_params = [{transform_indices = @transform_0, window_bounds = array<i64: 2, 16, 32>}, {pipeline_mode = #tpu.pipeline_mode<synchronous>, transform_indices = @transform_1, window_bounds = array<i64: 32, 32>}, {pipeline_mode = #tpu.pipeline_mode<synchronous>, transform_indices = @transform_2, window_bounds = array<i64: 1, 32>}, {pipeline_mode = #tpu.pipeline_mode<synchronous>, transform_indices = @transform_3, window_bounds = array<i64: 32, 32>}, {pipeline_mode = #tpu.pipeline_mode<synchronous>, transform_indices = @transform_4, window_bounds = array<i64: 32, 32>}, {pipeline_mode = #tpu.pipeline_mode<synchronous>, transform_indices = @transform_5, window_bounds = array<i64: 1, 32>}, {pipeline_mode = #tpu.pipeline_mode<synchronous>, transform_indices = @transform_6, window_bounds = array<i64: 32, 128>}, {pipeline_mode = #tpu.pipeline_mode<synchronous>, transform_indices = @transform_7, window_bounds = array<i64: 1, 128>}, {transform_indices = @transform_8, window_bounds = array<i64: 16, 128>}]} {
    %c0 = arith.constant 0 : index
    %c0_0 = arith.constant 0 : index
    %c0_1 = arith.constant 0 : index
    %0 = vector.load %arg1[%c0, %c0_0, %c0_1] : memref<2x16x32xf32, #tpu.memory_space<vmem>>, vector<2x16x32xf32>
    %1 = vector.shape_cast %0 : vector<2x16x32xf32> to vector<32x32xf32>
    %c0_2 = arith.constant 0 : index
    %c0_3 = arith.constant 0 : index
    %2 = vector.load %arg2[%c0_2, %c0_3] : memref<32x32xf32, #tpu.memory_space<vmem>>, vector<32x32xf32>
    %cst = arith.constant dense<0.000000e+00> : vector<32x32xf32>
    %3 = tpu.matmul %1, %2, %cst {dimension_numbers = #tpu.dot_dimension_numbers<[1], [0], [0], [1], [0, 0, 1, 1], [], []>} : vector<32x32xf32>, vector<32x32xf32>, vector<32x32xf32> -> vector<32x32xf32>
    %c0_4 = arith.constant 0 : index
    %c0_5 = arith.constant 0 : index
    %4 = vector.load %arg3[%c0_4, %c0_5] : memref<1x32xf32, #tpu.memory_space<vmem>>, vector<1x32xf32>
    %5 = vector.broadcast %4 : vector<1x32xf32> to vector<32x32xf32>
    %6 = arith.addf %3, %5 : vector<32x32xf32>
    %cst_6 = arith.constant 0.000000e+00 : f32
    %7 = vector.broadcast %cst_6 : f32 to vector<32x32xf32>
    %8 = arith.maximumf %6, %7 : vector<32x32xf32>
    %9 = vector.extract_strided_slice %8 {offsets = [0, 0], sizes = [16, 32], strides = [1, 1]} : vector<32x32xf32> to vector<16x32xf32>
    %10 = vector.extract_strided_slice %8 {offsets = [16, 0], sizes = [16, 32], strides = [1, 1]} : vector<32x32xf32> to vector<16x32xf32>
    %c0_7 = arith.constant 0 : index
    %c0_8 = arith.constant 0 : index
    %11 = vector.load %arg4[%c0_7, %c0_8] : memref<32x32xf32, #tpu.memory_space<vmem>>, vector<32x32xf32>
    %cst_9 = arith.constant dense<0.000000e+00> : vector<16x32xf32>
    %12 = tpu.matmul %9, %11, %cst_9 {dimension_numbers = #tpu.dot_dimension_numbers<[1], [0], [0], [1], [0, 0, 1, 1], [], []>} : vector<16x32xf32>, vector<32x32xf32>, vector<16x32xf32> -> vector<16x32xf32>
    %c0_10 = arith.constant 0 : index
    %c0_11 = arith.constant 0 : index
    %13 = vector.load %arg5[%c0_10, %c0_11] : memref<32x32xf32, #tpu.memory_space<vmem>>, vector<32x32xf32>
    %cst_12 = arith.constant dense<0.000000e+00> : vector<16x32xf32>
    %14 = tpu.matmul %10, %13, %cst_12 {dimension_numbers = #tpu.dot_dimension_numbers<[1], [0], [0], [1], [0, 0, 1, 1], [], []>} : vector<16x32xf32>, vector<32x32xf32>, vector<16x32xf32> -> vector<16x32xf32>
    %15 = arith.addf %12, %14 : vector<16x32xf32>
    %c0_13 = arith.constant 0 : index
    %c0_14 = arith.constant 0 : index
    %16 = vector.load %arg6[%c0_13, %c0_14] : memref<1x32xf32, #tpu.memory_space<vmem>>, vector<1x32xf32>
    %17 = vector.broadcast %16 : vector<1x32xf32> to vector<16x32xf32>
    %18 = arith.addf %15, %17 : vector<16x32xf32>
    %cst_15 = arith.constant 0.000000e+00 : f32
    %19 = vector.broadcast %cst_15 : f32 to vector<16x32xf32>
    %20 = arith.maximumf %18, %19 : vector<16x32xf32>
    %c0_16 = arith.constant 0 : index
    %c0_17 = arith.constant 0 : index
    %21 = vector.load %arg7[%c0_16, %c0_17] : memref<32x128xf32, #tpu.memory_space<vmem>>, vector<32x128xf32>
    %cst_18 = arith.constant dense<0.000000e+00> : vector<16x128xf32>
    %22 = tpu.matmul %20, %21, %cst_18 {dimension_numbers = #tpu.dot_dimension_numbers<[1], [0], [0], [1], [0, 0, 1, 1], [], []>} : vector<16x32xf32>, vector<32x128xf32>, vector<16x128xf32> -> vector<16x128xf32>
    %c0_19 = arith.constant 0 : index
    %c0_20 = arith.constant 0 : index
    %23 = vector.load %arg8[%c0_19, %c0_20] : memref<1x128xf32, #tpu.memory_space<vmem>>, vector<1x128xf32>
    %24 = vector.broadcast %23 : vector<1x128xf32> to vector<16x128xf32>
    %25 = arith.addf %22, %24 : vector<16x128xf32>
    %cst_21 = arith.constant dense<0xFF800000> : vector<16xf32>
    %26 = vector.multi_reduction <maximumf>, %25, %cst_21 [1] : vector<16x128xf32> to vector<16xf32>
    %27 = vector.shape_cast %26 : vector<16xf32> to vector<16x1xf32>
    %28 = vector.broadcast %27 : vector<16x1xf32> to vector<16x128xf32>
    %29 = arith.subf %25, %28 : vector<16x128xf32>
    %30 = math.exp %29 : vector<16x128xf32>
    %cst_22 = arith.constant dense<0.000000e+00> : vector<16xf32>
    %31 = vector.multi_reduction <add>, %30, %cst_22 [1] : vector<16x128xf32> to vector<16xf32>
    %32 = vector.shape_cast %31 : vector<16xf32> to vector<16x1xf32>
    %33 = tpu.reciprocal %32 {approx = true} : vector<16x1xf32> -> vector<16x1xf32>
    %34 = vector.broadcast %33 : vector<16x1xf32> to vector<16x128xf32>
    %35 = arith.mulf %30, %34 : vector<16x128xf32>
    %c0_23 = arith.constant 0 : index
    %c0_24 = arith.constant 0 : index
    %36 = vector.load %arg9[%c0_23, %c0_24] : memref<16x128xf32, #tpu.memory_space<vmem>>, vector<16x128xf32>
    tpu.vector_store %arg9[%c0_23, %c0_24], %35 {strides = array<i32>} : memref<16x128xf32, #tpu.memory_space<vmem>>, vector<16x128xf32>,
    return
  }
  func.func @transform_0(%arg0: i32) -> (i32, i32, i32) {
    %c0_i32 = arith.constant 0 : i32
    %c0_i32_0 = arith.constant 0 : i32
    %c0_i32_1 = arith.constant 0 : i32
    return %c0_i32, %arg0, %c0_i32_0 : i32, i32, i32
  }
  func.func @transform_1(%arg0: i32) -> (i32, i32) {
    %c0_i32 = arith.constant 0 : i32
    %c0_i32_0 = arith.constant 0 : i32
    %c0_i32_1 = arith.constant 0 : i32
    return %c0_i32, %c0_i32_0 : i32, i32
  }
  func.func @transform_2(%arg0: i32) -> (i32, i32) {
    %c0_i32 = arith.constant 0 : i32
    %c0_i32_0 = arith.constant 0 : i32
    %c0_i32_1 = arith.constant 0 : i32
    return %c0_i32, %c0_i32_0 : i32, i32
  }
  func.func @transform_3(%arg0: i32) -> (i32, i32) {
    %c0_i32 = arith.constant 0 : i32
    %c0_i32_0 = arith.constant 0 : i32
    %c0_i32_1 = arith.constant 0 : i32
    return %c0_i32, %c0_i32_0 : i32, i32
  }
  func.func @transform_4(%arg0: i32) -> (i32, i32) {
    %c0_i32 = arith.constant 0 : i32
    %c0_i32_0 = arith.constant 0 : i32
    %c0_i32_1 = arith.constant 0 : i32
    return %c0_i32, %c0_i32_0 : i32, i32
  }
  func.func @transform_5(%arg0: i32) -> (i32, i32) {
    %c0_i32 = arith.constant 0 : i32
    %c0_i32_0 = arith.constant 0 : i32
    %c0_i32_1 = arith.constant 0 : i32
    return %c0_i32, %c0_i32_0 : i32, i32
  }
  func.func @transform_6(%arg0: i32) -> (i32, i32) {
    %c0_i32 = arith.constant 0 : i32
    %c0_i32_0 = arith.constant 0 : i32
    %c0_i32_1 = arith.constant 0 : i32
    return %c0_i32, %c0_i32_0 : i32, i32
  }
  func.func @transform_7(%arg0: i32) -> (i32, i32) {
    %c0_i32 = arith.constant 0 : i32
    %c0_i32_0 = arith.constant 0 : i32
    %c0_i32_1 = arith.constant 0 : i32
    return %c0_i32, %c0_i32_0 : i32, i32
  }
  func.func @transform_8(%arg0: i32) -> (i32, i32) {
    %c0_i32 = arith.constant 0 : i32
    %c0_i32_0 = arith.constant 0 : i32
    return %arg0, %c0_i32 : i32, i32
  }
}

</mosaic_0001>

<bundles_post_ra>
// kernel: mlp_forward.1
= control target key start
LH: loop header
LB: loop body
LE: loop exit
PB: predicated region body
PF: predicated region fallthrough
CT: control target
= control target key end

     0   :  { %vm44_vm0 = vcmask 261120   ;;  %s667_s1 = inlined_call_operand.vmem [shape: f32[32,32], index: 1, kind: input, shape index: {}]   ;;  %s668_s0 = inlined_call_operand.vmem [shape: f32[2,16,32], index: 0, kind: input, shape index: {}]   ;;  %s669_s3 = inlined_call_operand.vmem [shape: f32[32,32], index: 3, kind: input, shape index: {}]   ;;  %s670_s4 = inlined_call_operand.vmem [shape: f32[32,32], index: 4, kind: input, shape index: {}]   ;;  %s671_s2 = inlined_call_operand.vmem [shape: f32[1,32], index: 2, kind: input, shape index: {}]   ;;  %s672_s6 = inlined_call_operand.vmem [shape: f32[32,128], index: 6, kind: input, shape index: {}]   ;;  %s673_s5 = inlined_call_operand.vmem [shape: f32[1,32], index: 5, kind: input, shape index: {}]   ;;  %s674_s7 = inlined_call_operand.vmem [shape: f32[1,128], index: 7, kind: input, shape index: {}]   ;;  %s675_s8 = inlined_call_operand.vmem [shape: f32[16,128], index: 8, kind: output, shape index: {}]  }
   0x1   :  { %v36_v0 = vld [vmem:[%s667_s1 + $0x18] sm:$0xff]  ;;  %v35_v1 = vld [vmem:[%s667_s1 + $0x10] sm:$0xff]  ;;  %v29_v2 = vld [vmem:[%s668_s0] sm:$0xff] }
   0x2   :  { %482 = vmatprep.subr.mxu0 %v36_v0  ;;  %v34_v3 = vld [vmem:[%s667_s1 + $0x8] sm:$0xff]  ;;  %490 = vmatprep.mubr.msk.f32.mxu0 %vm44_vm0, %v29_v2  ;;  %v33_v4 = vld [vmem:[%s667_s1] sm:$0xff]  ;;  %v31_v6 = vld [vmem:[%s668_s0 + $0x10] sm:$0xff] }
   0x3   :  { %483 = vmatpush3.msra.mxu0 %v36_v0  ;;  %v30_v5 = vld [vmem:[%s668_s0 + $0x8] sm:$0xff]  ;;  %v32_v7 = vld [vmem:[%s668_s0 + $0x18] sm:$0xff]  ;;  %v148_v9 = vld [vmem:[%s669_s3 + $0x10] sm:$0xff] }
   0x4   :  { %484 = vmatprep.subr.mxu0 %v35_v1  ;;  %v149_v8 = vld [vmem:[%s669_s3 + $0x18] sm:$0xff]  ;;  %v147_v11 = vld [vmem:[%s669_s3 + $0x8] sm:$0xff]  ;;  %v152_v12 = vld [vmem:[%s670_s4 + $0x10] sm:$0xff] }
   0x5   :  { %485 = vmatpush3.msra.mxu0 %v35_v1  ;;  %v153_v10 = vld [vmem:[%s670_s4 + $0x18] sm:$0xff]  ;;  %v146_v13 = vld [vmem:[%s669_s3] sm:$0xff]  ;;  %v151_v14 = vld [vmem:[%s670_s4 + $0x8] sm:$0xff] }
   0x6   :  { %486 = vmatprep.subr.mxu0 %v34_v3  ;;  %496 = vmatprep.subr.mxu1 %v153_v10  ;;  %v150_v15 = vld [vmem:[%s670_s4] sm:$0xff]  ;;  %v330_v29 = vld [vmem:[%s672_s6 + $0x18] sm:$0xff]  ;;  %v329_v30 = vld [vmem:[%s672_s6 + $0x10] sm:$0xff] }
   0x7   :  { %487 = vmatpush3.msra.mxu0 %v34_v3  ;;  %497 = vmatpush3.msra.mxu1 %v153_v10  ;;  %v443_v16 = vld [vmem:[%s671_s2] ss:$0 sm:$0xff]  ;;  %v328_v31 = vld [vmem:[%s672_s6 + $0x8] sm:$0xff] }
   0x8   :  { %488 = vmatprep.subr.mxu0 %v33_v4  ;;  %498 = vmatprep.subr.mxu1 %v152_v12  ;;  %v327_v32 = vld [vmem:[%s672_s6] sm:$0xff] }
   0x9   :  { %489 = vmatpush3.msra.mxu0 %v33_v4  ;;  %499 = vmatpush3.msra.mxu1 %v152_v12  ;;  %v452_v36 = vld [vmem:[%s673_s5] ss:$0 sm:$0xff] }
   0xa   :  { %491 = vmatmul.mubr.msk.f32.vlgmr.msra.gmra.mxu0 %vm44_vm0, %v30_v5  ;;  %507 = vmatprep.subr.mxu0 %v149_v8  ;;  %v453_v45 = vld [vmem:[%s674_s7] ss:$0 sm:$0xff] }
   0xb   :  { %493 = vmatprep.mubr.msk.f32.mxu0 %vm44_vm0, %v31_v6  ;;  %508 = vmatpush3.msra.mxu0 %v149_v8 }
   0xc   :  { %509 = vmatprep.subr.mxu0 %v148_v9  ;;  %500 = vmatprep.subr.mxu1 %v151_v14 }
   0xd   :  { %510 = vmatpush3.msra.mxu0 %v148_v9  ;;  %501 = vmatpush3.msra.mxu1 %v151_v14 }
   0xe   :  { %494 = vmatmul.mubr.msk.f32.gmra.mxu0 %vm44_vm0, %v32_v7  ;;  %511 = vmatprep.subr.mxu0 %v147_v11 }
   0xf   :  { %512 = vmatpush3.msra.mxu0 %v147_v11  ;;  %502 = vmatprep.subr.mxu1 %v150_v15 }
  0x10   :  { %513 = vmatprep.subr.mxu0 %v146_v13  ;;  %503 = vmatpush3.msra.mxu1 %v150_v15 }
  0x11   :  { %514 = vmatpush3.msra.mxu0 %v146_v13  ;;  %518 = vmatprep.subr.mxu1 %v330_v29 }
  0xca   :  { %v492_v17 = vpop.f32.mrf.mxu0 }
  0xcb   :  { %v129_v18 = vadd.f32 %v492_v17, %v443_v16 }
  0xcc   :  { %v123_v19 = vpop.f32.mrf.mxu0 }
  0xcd   :  { %v124_v20 = vadd.f32 %v443_v16, %v123_v19  ;;  %v143_v23 = vmax.f32 %v129_v18, 0.0 }
  0xce   :  { %v495_v21 = vpop.f32.mrf.mxu0 }
  0xcf   :  { %v142_v22 = vmax.f32 %v124_v20, 0.0  ;;  %v139_v24 = vadd.f32 %v495_v21, %v443_v16 }
  0xd0   :  { %v133_v25 = vpop.f32.mrf.mxu0 }
  0xd1   :  { %v134_v26 = vadd.f32 %v443_v16, %v133_v25  ;;  %515 = vmatprep.mubr.msk.f32.mxu0 %vm44_vm0, %v142_v22  ;;  %v145_v28 = vmax.f32 %v139_v24, 0.0 }
  0xd2   :  { %516 = vmatmul.mubr.msk.f32.vlgmr.msra.gmra.mxu0 %vm44_vm0, %v143_v23 }
  0xd3   :  { %v144_v27 = vmax.f32 %v134_v26, 0.0 }
  0xd5   :  { %504 = vmatprep.mubr.msk.f32.mxu1 %vm44_vm0, %v144_v27 }
  0xd6   :  { %505 = vmatmul.mubr.msk.f32.vlgmr.msra.gmra.mxu1 %vm44_vm0, %v145_v28 }
  0xd7   :  { %519 = vmatpush3.msra.mxu1 %v330_v29 }
  0xd8   :  { %520 = vmatprep.subr.mxu1 %v329_v30 }
  0xd9   :  { %521 = vmatpush3.msra.mxu1 %v329_v30 }
  0xda   :  { %522 = vmatprep.subr.mxu1 %v328_v31 }
  0xdb   :  { %523 = vmatpush3.msra.mxu1 %v328_v31 }
  0xdc   :  { %524 = vmatprep.subr.mxu1 %v327_v32 }
  0xdd   :  { %525 = vmatpush3.msra.mxu1 %v327_v32 }
 0x192   :  { %v517_v33 = vpop.f32.mrf.mxu0 }
 0x194   :  { %v307_v37 = vpop.f32.mrf.mxu0 }
 0x196   :  { %v506_v34 = vpop.f32.mrf.mxu1 }
 0x197   :  { %v313_v35 = vadd.f32 %v517_v33, %v506_v34 }
 0x198   :  { %v226_v38 = vpop.f32.mrf.mxu1 }
 0x199   :  { %v308_v39 = vadd.f32 %v307_v37, %v226_v38  ;;  %v324_v40 = vadd.f32 %v452_v36, %v313_v35 }
 0x19b   :  { %v323_v41 = vadd.f32 %v452_v36, %v308_v39  ;;  %v326_v43 = vmax.f32 %v324_v40, 0.0 }
 0x19d   :  { %v325_v42 = vmax.f32 %v323_v41, 0.0 }
 0x19f   :  { %526 = vmatprep.mubr.msk.f32.mxu1 %vm44_vm0, %v325_v42 }
 0x1a0   :  { %527 = vmatmul.mubr.msk.f32.vlgmr.msra.gmra.mxu1 %vm44_vm0, %v326_v43 }
 0x260   :  { %v528_v44 = vpop.f32.mrf.mxu1 }
 0x261   :  { %v416_v48 = vadd.f32 %v528_v44, %v453_v45 }
 0x262   :  { %v410_v46 = vpop.f32.mrf.mxu1 }
 0x263   :  { %v411_v47 = vadd.f32 %v453_v45, %v410_v46 }
 0x265   :  { %419 = vmax.xlane.f32.xlu0 %v411_v47 }
 0x269   :  { %421 = vmax.xlane.f32.xlu0 %v416_v48 }
 0x2ee   :  { %v420_v49 = vpop.xlane.xlu0 %419 }
 0x2ef   :  { %v423_v50 = vsub.f32 %v411_v47, %v420_v49 }
 0x2f1   :  { %v425_v51 = vmul.f32 1.442695, %v423_v50 }
 0x2f2   :  { %v422_v52 = vpop.xlane.xlu0 %421 }
 0x2f3   :  { %529 = vpow2.f32 %v425_v51  ;;  %v424_v53 = vsub.f32 %v416_v48, %v422_v52 }
 0x2f5   :  { %v427_v54 = vmul.f32 1.442695, %v424_v53 }
 0x2f7   :  { %531 = vpow2.f32 %v427_v54 }
 0x300   :  { %v530_v55 = vpop.eup %529 }
 0x301   :  { %429 = vadd.xlane.f32.xlu1 %v530_v55 }
 0x304   :  { %v532_v56 = vpop.eup %531 }
 0x305   :  { %431 = vadd.xlane.f32.xlu1 %v532_v56 }
 0x38a   :  { %v430_v57 = vpop.xlane.xlu1 %429 }
 0x38b   :  { %533 = vrcp.f32 %v430_v57 }
 0x38e   :  { %v432_v58 = vpop.xlane.xlu1 %431 }
 0x38f   :  { %535 = vrcp.f32 %v432_v58 }
 0x398   :  { %v534_v59 = vpop.eup %533 }
 0x399   :  { %v435_v60 = vmul.f32 %v534_v59, %v530_v55 }
 0x39b   :  { %437 = vst [vmem:[%s675_s8] sm:$0xff] %v435_v60 }
 0x39c   :  { %v536_v61 = vpop.eup %535 }
 0x39d   :  { %v436_v62 = vmul.f32 %v536_v61, %v532_v56 }
 0x39f   :  { %438 = vst [vmem:[%s675_s8 + $0x8] sm:$0xff] %v436_v62 }

</bundles_post_ra>
